<compile_context>
chip_gen: v7x
topology: tpu7x:2x2x1
jax: 0.10.0
libtpu: 0.0.40
codegen_flags: <defaults>
</compile_context>

<pallas_src>
import jax
import jax.numpy as jnp
from jax.experimental import pallas as pl
from jax.experimental.pallas import tpu as pltpu


_COMPUTE_DTYPE = jnp.bfloat16   # MXU-native operand dtype on v5e / v6e / v7x.


def _deconv2x2_kernel_wide(x_ref, w_ref, b_ref, o_ref):
    """Single wide matmul; used when 2*Cout % 128 == 0 (lane-aligned kh split).

    x_ref: (1, th, W, Cin)        bf16 input pixels (NHWC block)
    w_ref: (Cin, 4*Cout)          bf16 deconv weight, columns ordered (kh, kw, co)
    b_ref: (1, 4*Cout)            f32 bias repeated per (kh, kw) tap
    o_ref: (1, th, 2, W, 2*Cout)  == NHWC out rows 2*i+kh, cols (2*j+kw, co)
    """
    th, W, cin = x_ref.shape[1], x_ref.shape[2], x_ref.shape[3]
    c2 = o_ref.shape[4]                               # 2*Cout: one kh column half

    x = x_ref[0].reshape(th * W, cin)                 # rows = (i, j)
    y = jnp.dot(x, w_ref[...], preferred_element_type=jnp.float32) + b_ref[...]
    y = y.astype(o_ref.dtype)                         # (th*W, 4*Cout)

    # kh = 0 -> even output rows, kh = 1 -> odd output rows.  Each half's (j, kw, co)
    # content is exactly the (2*j+kw, co) output layout.  Slices are 128-aligned here.
    o_ref[0, :, 0, :, :] = y[:, :c2].reshape(th, W, c2)
    o_ref[0, :, 1, :, :] = y[:, c2:].reshape(th, W, c2)


def _deconv2x2_kernel_split(x_ref, w_ref, b_ref, o_ref):
    """Two kh-halved matmuls; used when 2*Cout is NOT a multiple of 128 so the matmul
    result is never sliced at a non-lane-aligned column.

    x_ref: (1, th, W, Cin)          bf16 input pixels (NHWC block)
    w_ref: (2, Cin, 2*Cout)         bf16 weight, kh-major, columns ordered (kw, co)
    b_ref: (1, 2*Cout)              f32 bias repeated per kw tap
    o_ref: (1, th, 2, W, 2*Cout)
    """
    th, W, cin = x_ref.shape[1], x_ref.shape[2], x_ref.shape[3]
    c2 = o_ref.shape[4]

    x = x_ref[0].reshape(th * W, cin)
    y0 = jnp.dot(x, w_ref[0], preferred_element_type=jnp.float32) + b_ref[...]
    y1 = jnp.dot(x, w_ref[1], preferred_element_type=jnp.float32) + b_ref[...]
    o_ref[0, :, 0, :, :] = y0.astype(o_ref.dtype).reshape(th, W, c2)
    o_ref[0, :, 1, :, :] = y1.astype(o_ref.dtype).reshape(th, W, c2)


def _vmem_caps():
    """(tile-picker budget, scoped vmem limit) in bytes, per TPU generation."""
    try:
        cap = pltpu.get_tpu_info().vmem_capacity_bytes
    except Exception:
        cap = 64 * 1024 * 1024                      # conservative if query fails
    if cap >= 96 * 1024 * 1024:                     # v5e / v6e: 128 MiB physical
        return 48 * 1024 * 1024, 64 * 1024 * 1024
    return 28 * 1024 * 1024, 48 * 1024 * 1024       # v7x: 64 MiB per TensorCore


def _pick_rows_per_block(N, H, W, cin, cout, in_itemsize, out_itemsize,
                         vmem_budget, max_rows=4096):
    """Input-image rows per grid step (each expands to 2 output rows)."""

    def block_bytes(t):
        x_b = t * W * cin * in_itemsize
        o_b = t * 2 * W * 2 * cout * out_itemsize
        y_b = t * W * 4 * cout * 4                  # f32 matmul intermediate in VMEM
        w_b = cin * 4 * cout * in_itemsize + 4 * cout * 4
        return 2 * (x_b + o_b) + y_b + 2 * w_b      # double-buffered in/out + weights

    divisors = sorted((t for t in range(1, H + 1) if H % t == 0), reverse=True)
    fallback = None
    for t in divisors:
        if block_bytes(t) > vmem_budget:
            continue
        if fallback is None:
            fallback = t                            # largest divisor that fits VMEM
        steps = N * (H // t)
        aligned = (t % 8 == 0) or (t == H)
        if steps >= 2 and steps % 2 == 0 and aligned and t * W <= max_rows:
            return t                                # even steps, aligned, modest M
    if fallback is not None:
        if N * pl.cdiv(H, fallback) < 2 and H > 1:  # give v7x's 2nd core some work
            fallback = (H + 1) // 2
        return fallback
    t = H
    while t > 1 and block_bytes(t) > vmem_budget:
        t = (t + 1) // 2
    return max(1, t)


def deconv2x2_stride2_nhwc(x_nhwc, weight, bias, *, rows_per_block=None,
                           out_dtype=None):
    """ConvTranspose2d(k=2, s=2) on an NHWC input; returns NHWC (N, 2H, 2W, Cout).

    weight: (Cin, Cout, 2, 2) PyTorch ConvTranspose2d layout; bias: (Cout,).
    """
    N, H, W, Cin = x_nhwc.shape
    Cout = weight.shape[1]
    c2 = 2 * Cout
    out_dtype = out_dtype if out_dtype is not None else x_nhwc.dtype

    x_c = x_nhwc.astype(_COMPUTE_DTYPE)
    vmem_budget, vmem_limit = _vmem_caps()
    th = rows_per_block or _pick_rows_per_block(
        N, H, W, Cin, Cout,
        jnp.dtype(_COMPUTE_DTYPE).itemsize, jnp.dtype(out_dtype).itemsize,
        vmem_budget)

    wide = (c2 % 128 == 0)
    if wide:
        # (Cin, Cout, kh, kw) -> (Cin, kh, kw, Cout) -> (Cin, 4*Cout): cols (kh, kw, co).
        kernel = _deconv2x2_kernel_wide
        w_arg = jnp.transpose(weight, (0, 2, 3, 1)).reshape(Cin, 4 * Cout)
        w_arg = w_arg.astype(_COMPUTE_DTYPE)
        b_arg = jnp.tile(bias.astype(jnp.float32), 4).reshape(1, 4 * Cout)
        w_spec = pl.BlockSpec((Cin, 4 * Cout), lambda n, h: (0, 0))
        b_spec = pl.BlockSpec((1, 4 * Cout), lambda n, h: (0, 0))
    else:
        # kh-major weight (2, Cin, 2*Cout): avoids non-lane-aligned result slicing.
        kernel = _deconv2x2_kernel_split
        w_arg = jnp.transpose(weight, (2, 0, 3, 1)).reshape(2, Cin, c2)
        w_arg = w_arg.astype(_COMPUTE_DTYPE)
        b_arg = jnp.tile(bias.astype(jnp.float32), 2).reshape(1, c2)
        w_spec = pl.BlockSpec((2, Cin, c2), lambda n, h: (0, 0, 0))
        b_spec = pl.BlockSpec((1, c2), lambda n, h: (0, 0))

    flops = 2 * N * H * W * Cin * 4 * Cout
    bytes_accessed = (
        int(x_c.size) * jnp.dtype(_COMPUTE_DTYPE).itemsize
        + int(w_arg.size) * jnp.dtype(_COMPUTE_DTYPE).itemsize
        + int(b_arg.size) * 4
        + N * H * 2 * W * c2 * jnp.dtype(out_dtype).itemsize)

    out6 = pl.pallas_call(
        kernel,
        out_shape=jax.ShapeDtypeStruct((N, H, 2, W, c2), out_dtype),
        grid=(N, pl.cdiv(H, th)),
        in_specs=[
            pl.BlockSpec((1, th, W, Cin), lambda n, h: (n, h, 0, 0)),
            w_spec,
            b_spec,
        ],
        out_specs=pl.BlockSpec((1, th, 2, W, c2), lambda n, h: (n, h, 0, 0, 0)),
        compiler_params=pltpu.CompilerParams(
            dimension_semantics=("parallel", "parallel"),
            vmem_limit_bytes=vmem_limit,
        ),
        cost_estimate=pl.CostEstimate(
            flops=int(flops), transcendentals=0, bytes_accessed=int(bytes_accessed)),
    )(x_c, w_arg, b_arg)

    # (N, H, 2, W, 2*Cout) is byte-identical to NHWC (N, 2H, 2W, Cout): free reshape.
    return out6.reshape(N, 2 * H, 2 * W, Cout)


@jax.jit
def up_concat_forward(inputs, down_outputs, weight, bias):
    """UpConcat.forward: deconv(inputs) then concat([down_outputs, deconv], dim=1).

    inputs:        (N, Cin, H, W)        NCHW, like the PyTorch module
    down_outputs:  (N, Cout, 2H, 2W)     NCHW
    weight:        (Cin, Cout, 2, 2)     ConvTranspose2d weight
    bias:          (Cout,)
    returns:       (N, 2*Cout, 2H, 2W)   NCHW
    """
    # NCHW -> NHWC for the activation only (x is the smallest tensor here).
    x_nhwc = jnp.transpose(inputs, (0, 2, 3, 1))
    up_nhwc = deconv2x2_stride2_nhwc(x_nhwc, weight, bias, out_dtype=inputs.dtype)

    # Single boundary transpose back to NCHW; the channel concat rides on it
    # (down_outputs stays NCHW the whole time).
    up_nchw = jnp.transpose(up_nhwc, (0, 3, 1, 2))
    return jnp.concatenate([down_outputs, up_nchw], axis=1)


def _reference(inputs, down_outputs, weight, bias):
    # Pure-JAX f32 reference of ConvTranspose2d(k=2, s=2) + concat for verification.
    N, Cin, H, W = inputs.shape
    Cout = weight.shape[1]
    t = jnp.einsum("ncij,cokl->noijkl", inputs, weight)          # (N,Cout,H,W,2,2)
    t = jnp.transpose(t, (0, 1, 2, 4, 3, 5)).reshape(N, Cout, 2 * H, 2 * W)
    t = t + bias.reshape(1, Cout, 1, 1)
    return jnp.concatenate([down_outputs, t], axis=1)


if __name__ == "__main__":
    key = jax.random.PRNGKey(0)

    def run_case(case_key, in_feat, out_feat, N, H, W):
        k_in, k_down, k_w, k_b = jax.random.split(case_key, 4)
        inputs = jax.random.normal(k_in, (N, in_feat, H, W), dtype=jnp.float32)
        down_outputs = jax.random.normal(k_down, (N, out_feat, 2 * H, 2 * W),
                                         dtype=jnp.float32)
        weight = jax.random.normal(k_w, (in_feat, out_feat, 2, 2),
                                   dtype=jnp.float32) * 0.1
        bias = jax.random.normal(k_b, (out_feat,), dtype=jnp.float32) * 0.1

        out = jax.block_until_ready(
            up_concat_forward(inputs, down_outputs, weight, bias))
        ref = _reference(inputs, down_outputs, weight, bias)
        assert out.shape == (N, 2 * out_feat, 2 * H, 2 * W), out.shape
        # bf16 operands / f32 accumulation: tolerance loosened vs exact f32 numerics.
        assert jnp.allclose(out, ref, atol=1e-2, rtol=1e-2), "mismatch vs reference"

    k1, k2 = jax.random.split(key)
    run_case(k1, 8, 4, 2, 8, 8)      # 2*Cout = 8   -> kh-split kernel path
    run_case(k2, 8, 64, 2, 8, 8)     # 2*Cout = 128 -> wide single-dot kernel path

    print("KERNEL_OK")
</pallas_src>

<mosaic_0001>
module attributes {stable_mosaic.version = 11 : i64} {
  func.func @_deconv2x2_kernel_split(%arg0: i32, %arg1: i32, %arg2: memref<1x8x8x8xbf16, #tpu.memory_space<vmem>>, %arg3: memref<2x8x8xbf16, #tpu.memory_space<vmem>>, %arg4: memref<1x8xf32, #tpu.memory_space<vmem>>, %arg5: memref<1x8x2x8x8xf32, #tpu.memory_space<vmem>>) attributes {dimension_semantics = [#tpu.dimension_semantics<parallel>, #tpu.dimension_semantics<parallel>], iteration_bounds = array<i64: 2, 1>, scalar_prefetch = 0 : i64, scratch_operands = 0 : i64, tpu.core_type = #tpu.core_type<tc>, window_params = [{transform_indices = @transform_0, window_bounds = array<i64: 1, 8, 8, 8>}, {pipeline_mode = #tpu.pipeline_mode<synchronous>, transform_indices = @transform_1, window_bounds = array<i64: 2, 8, 8>}, {pipeline_mode = #tpu.pipeline_mode<synchronous>, transform_indices = @transform_2, window_bounds = array<i64: 1, 8>}, {transform_indices = @transform_3, window_bounds = array<i64: 1, 8, 2, 8, 8>}]} {
    %c0 = arith.constant 0 : index
    %c0_0 = arith.constant 0 : index
    %c0_1 = arith.constant 0 : index
    %c0_2 = arith.constant 0 : index
    %0 = vector.load %arg2[%c0, %c0_0, %c0_1, %c0_2] : memref<1x8x8x8xbf16, #tpu.memory_space<vmem>>, vector<1x8x8x8xbf16>
    %1 = vector.shape_cast %0 : vector<1x8x8x8xbf16> to vector<8x8x8xbf16>
    %2 = vector.shape_cast %1 : vector<8x8x8xbf16> to vector<64x8xbf16>
    %c0_3 = arith.constant 0 : index
    %c0_4 = arith.constant 0 : index
    %c0_5 = arith.constant 0 : index
    %3 = vector.load %arg3[%c0_3, %c0_4, %c0_5] : memref<2x8x8xbf16, #tpu.memory_space<vmem>>, vector<1x8x8xbf16>
    %4 = vector.shape_cast %3 : vector<1x8x8xbf16> to vector<8x8xbf16>
    %cst = arith.constant dense<0.000000e+00> : vector<64x8xf32>
    %5 = tpu.matmul %2, %4, %cst {dimension_numbers = #tpu.dot_dimension_numbers<[1], [0], [0], [1], [0, 0, 1, 1], [], []>} : vector<64x8xbf16>, vector<8x8xbf16>, vector<64x8xf32> -> vector<64x8xf32>
    %c0_6 = arith.constant 0 : index
    %c0_7 = arith.constant 0 : index
    %6 = vector.load %arg4[%c0_6, %c0_7] : memref<1x8xf32, #tpu.memory_space<vmem>>, vector<1x8xf32>
    %7 = vector.broadcast %6 : vector<1x8xf32> to vector<64x8xf32>
    %8 = arith.addf %5, %7 : vector<64x8xf32>
    %c1 = arith.constant 1 : index
    %c0_8 = arith.constant 0 : index
    %c0_9 = arith.constant 0 : index
    %9 = vector.load %arg3[%c1, %c0_8, %c0_9] : memref<2x8x8xbf16, #tpu.memory_space<vmem>>, vector<1x8x8xbf16>
    %10 = vector.shape_cast %9 : vector<1x8x8xbf16> to vector<8x8xbf16>
    %cst_10 = arith.constant dense<0.000000e+00> : vector<64x8xf32>
    %11 = tpu.matmul %2, %10, %cst_10 {dimension_numbers = #tpu.dot_dimension_numbers<[1], [0], [0], [1], [0, 0, 1, 1], [], []>} : vector<64x8xbf16>, vector<8x8xbf16>, vector<64x8xf32> -> vector<64x8xf32>
    %c0_11 = arith.constant 0 : index
    %c0_12 = arith.constant 0 : index
    %12 = vector.load %arg4[%c0_11, %c0_12] : memref<1x8xf32, #tpu.memory_space<vmem>>, vector<1x8xf32>
    %13 = vector.broadcast %12 : vector<1x8xf32> to vector<64x8xf32>
    %14 = arith.addf %11, %13 : vector<64x8xf32>
    %15 = vector.shape_cast %8 : vector<64x8xf32> to vector<8x8x8xf32>
    %c0_13 = arith.constant 0 : index
    %c0_14 = arith.constant 0 : index
    %c0_15 = arith.constant 0 : index
    %c0_16 = arith.constant 0 : index
    %c0_17 = arith.constant 0 : index
    %16 = vector.load %arg5[%c0_13, %c0_14, %c0_15, %c0_16, %c0_17] : memref<1x8x2x8x8xf32, #tpu.memory_space<vmem>>, vector<1x8x1x8x8xf32>
    %17 = vector.shape_cast %16 : vector<1x8x1x8x8xf32> to vector<8x8x8xf32>
    %18 = vector.shape_cast %15 : vector<8x8x8xf32> to vector<1x8x1x8x8xf32>
    tpu.vector_store %arg5[%c0_13, %c0_14, %c0_15, %c0_16, %c0_17], %18 {strides = array<i32>} : memref<1x8x2x8x8xf32, #tpu.memory_space<vmem>>, vector<1x8x1x8x8xf32>,
    %19 = vector.shape_cast %14 : vector<64x8xf32> to vector<8x8x8xf32>
    %c0_18 = arith.constant 0 : index
    %c0_19 = arith.constant 0 : index
    %c1_20 = arith.constant 1 : index
    %c0_21 = arith.constant 0 : index
    %c0_22 = arith.constant 0 : index
    %20 = vector.load %arg5[%c0_18, %c0_19, %c1_20, %c0_21, %c0_22] : memref<1x8x2x8x8xf32, #tpu.memory_space<vmem>>, vector<1x8x1x8x8xf32>
    %21 = vector.shape_cast %20 : vector<1x8x1x8x8xf32> to vector<8x8x8xf32>
    %22 = vector.shape_cast %19 : vector<8x8x8xf32> to vector<1x8x1x8x8xf32>
    tpu.vector_store %arg5[%c0_18, %c0_19, %c1_20, %c0_21, %c0_22], %22 {strides = array<i32>} : memref<1x8x2x8x8xf32, #tpu.memory_space<vmem>>, vector<1x8x1x8x8xf32>,
    return
  }
  func.func @transform_0(%arg0: i32, %arg1: i32) -> (i32, i32, i32, i32) {
    %c0_i32 = arith.constant 0 : i32
    %c0_i32_0 = arith.constant 0 : i32
    %c0_i32_1 = arith.constant 0 : i32
    return %arg0, %arg1, %c0_i32, %c0_i32_0 : i32, i32, i32, i32
  }
  func.func @transform_1(%arg0: i32, %arg1: i32) -> (i32, i32, i32) {
    %c0_i32 = arith.constant 0 : i32
    %c0_i32_0 = arith.constant 0 : i32
    %c0_i32_1 = arith.constant 0 : i32
    %c0_i32_2 = arith.constant 0 : i32
    return %c0_i32, %c0_i32_0, %c0_i32_1 : i32, i32, i32
  }
  func.func @transform_2(%arg0: i32, %arg1: i32) -> (i32, i32) {
    %c0_i32 = arith.constant 0 : i32
    %c0_i32_0 = arith.constant 0 : i32
    %c0_i32_1 = arith.constant 0 : i32
    return %c0_i32, %c0_i32_0 : i32, i32
  }
  func.func @transform_3(%arg0: i32, %arg1: i32) -> (i32, i32, i32, i32, i32) {
    %c0_i32 = arith.constant 0 : i32
    %c0_i32_0 = arith.constant 0 : i32
    %c0_i32_1 = arith.constant 0 : i32
    %c0_i32_2 = arith.constant 0 : i32
    return %arg0, %arg1, %c0_i32, %c0_i32_0, %c0_i32_1 : i32, i32, i32, i32, i32
  }
}

</mosaic_0001>

<bundles_post_ra>
// kernel: tile.8
= control target key start
LH: loop header
LB: loop body
LE: loop exit
PB: predicated region body
PF: predicated region fallthrough
CT: control target
= control target key end

     0   :  { %s22_s0 = inlined_call_operand.vmem [shape: f32[4], index: 0, kind: input, shape index: {}]   ;;  %s23_s1 = inlined_call_operand.vmem [shape: f32[2,4], index: 1, kind: output, shape index: {}]  }
   0x1   :  { %v4_v0 = vld [vmem:[%s22_s0] ss:$0 sm:$0xff] }
   0x2   :  { %5 = vst [vmem:[%s23_s1] sm:$0x3] %v4_v0 }

// kernel: tile.9
= control target key start
LH: loop header
LB: loop body
LE: loop exit
PB: predicated region body
PF: predicated region fallthrough
CT: control target
= control target key end

     0   :  { %vm7_vm0 = vcmask 31744   ;;  %vm13_vm1 = vcmask 64544   ;;  %s39_s0 = inlined_call_operand.vmem [shape: f32[2,4], index: 0, kind: input, shape index: {}]   ;;  %s40_s1 = inlined_call_operand.vmem [shape: f32[1,8], index: 1, kind: output, shape index: {}]  }
   0x1   :  { %v4_v0 = vld [vmem:[%s39_s0] sm:$0x3]  ;;  %s22_s0 = smov 4  }
   0x2   :  { %5 = vst [vmem:[#allocation1] sm:$0x3] %v4_v0 }
   0x9   :  { %v10_v1 = vld [vmem:[#allocation1 + $0x1] sm:$0x1]   ;;  %v6_v2 = vld [vmem:[#allocation1] sm:$0x1]  }
   0xa   :  { %11 = vrot.lane.b32.xlu0 %v10_v1, %s22_s0  ;;  %8 = vst.msk [vmem:[#allocation0] sm:$0x1] %vm7_vm0, %v6_v2  }
  0x7c   :  { %v12_v3 = vpop.permute.xlu0 %11  }
  0x7d   :  { %14 = vst.msk [vmem:[#allocation0] sm:$0x1] %vm13_vm1, %v12_v3  }
  0x84   :  { %v18_v4 = vld [vmem:[#allocation0] sm:$0x1] }
  0x85   :  { %20 = vst [vmem:[%s40_s1] sm:$0x1] %v18_v4 }

// kernel: up_concat_forward.1
= control target key start
LH: loop header
LB: loop body
LE: loop exit
PB: predicated region body
PF: predicated region fallthrough
CT: control target
= control target key end

     0   :  { %s650_s12 = smov 0   ;;  %s652_s13 = smov 0   ;;  %s734_s0 = inlined_call_operand.vmem [shape: bf16[2,8,8,8], index: 0, kind: input, shape index: {}]   ;;  %s735_s1 = inlined_call_operand.vmem [shape: bf16[2,8,8], index: 1, kind: input, shape index: {}]   ;;  %s736_s2 = inlined_call_operand.vmem [shape: f32[1,8], index: 2, kind: input, shape index: {}]   ;;  %s737_s3 = inlined_call_operand.vmem [shape: f32[2,8,2,8,8], index: 3, kind: output, shape index: {}]  }
   0x1   :  { %s654_s14 = smov 0  }
   0x2 LB: > { %s25_s15 = sadd.s32 1, %s624_s13  ;;  %p515_p0 = scmp.ge.s32.totalorder %s628_s14, 1  ;;  %s628_s14 = sphi %s654_s14, %s13_s14   ;;  %s624_s13 = sphi %s652_s13, %s739_s13   ;;  %s620_s12 = sphi %s650_s12, %s738_s12  }
   0x3   : > { %p27_p1 = scmp.ge.s32.totalorder %s25_s15, 2  ;;  %p158_p2 = scmp.lt.s32.totalorder %s628_s14, 3 }
   0x5   : > { %s741_s15 = smov (%p27_p1, %s25_s15), 0  ;;  %p159_p3 = pnand %p515_p0, %p158_p2 }
   0x6   : > { %v221_v0 = vld [vmem:[%s735_s1] sm:$0xf] (!%p159_p3)  ;;  %vm262_vm0 = vcmask (!%p159_p3), 1043456   ;;  %v529_v1 = vld [vmem:[%s735_s1 + $0x4] sm:$0xf] (!%p159_p3)  ;;  %p192_p4 = scmp.lt.s32.totalorder (!%p159_p3), %s620_s12, 1 }
   0x7   : > { %162 = sbr.rel (%p159_p3) target bundleno = 245 (0xf5), region = 32  ;;  %576 = vmatprep.subr.msk.bf16.mxu0 (!%p159_p3), %vm262_vm0, %v221_v0  ;;  %577 = vmatprep.subr.msk.bf16.mxu1 (!%p159_p3), %vm262_vm0, %v529_v1  ;;  %v264_v2 = vsel (!%p159_p3), %vm262_vm0, %v221_v0, 0  ;;  %v334_v3 = vsel (!%p159_p3), %vm262_vm0, %v529_v1, 0  ;;  %vm249_vm1 = vcmask (!%p159_p3), 64512   ;;  %v520_v8 = vld [vmem:[%s736_s2] ss:$0 sm:$0xff] (!%p159_p3) }
   0x8   : > { %557 = vmatpush3.bf16.msra.mxu0 (!%p159_p3), %v264_v2  ;;  %567 = vmatpush3.bf16.msra.mxu1 (!%p159_p3), %v334_v3 }
   0xe   : > { %s743_s12 = smov (!%p192_p4, %s620_s12), 1 }
   0xf   : > { %s544_s20 = sshll.u32 %s743_s12, 5  ;;  %s545_s24 = sshll.u32 %s743_s12, 7 }
  0x10   : > { %s199_s23 = scalar_lea.vmem %s734_s0, %s544_s20  ;;  %s691_s29 = scalar_lea.vmem %s737_s3, %s545_s24 }
  0x11   : > { %v602_v4 = vld [vmem:[%s199_s23] sm:$0xff]   ;;  %v603_v5 = vld [vmem:[%s199_s23 + $0x8] sm:$0xff]   ;;  %v604_v6 = vld [vmem:[%s199_s23 + $0x10] sm:$0xff]  }
  0x12   : > { %558 = vmatprep.mubr.msk.bf16.mxu0 %vm249_vm1, %v602_v4  ;;  %568 = vmatprep.mubr.msk.bf16.mxu1 %vm249_vm1, %v602_v4  ;;  %v605_v7 = vld [vmem:[%s199_s23 + $0x18] sm:$0xff]  }
  0x13   : > { %559 = vmatmul.mubr.msk.bf16.vlgmr.msra.gmra.mrb[0].mxu0 %vm249_vm1, %v603_v5  ;;  %569 = vmatmul.mubr.msk.bf16.vlgmr.msra.gmra.mrb[0].mxu1 %vm249_vm1, %v603_v5 }
  0x14   : > { %562 = vmatprep.mubr.msk.bf16.mxu0 %vm249_vm1, %v604_v6  ;;  %572 = vmatprep.mubr.msk.bf16.mxu1 %vm249_vm1, %v604_v6 }
  0x1b   : > { %563 = vmatmul.mubr.msk.bf16.gmra.mrb[4].mxu0 %vm249_vm1, %v605_v7  ;;  %573 = vmatmul.mubr.msk.bf16.gmra.mrb[4].mxu1 %vm249_vm1, %v605_v7 }
  0xe6   : > { %v560_v9 = vpop.f32.mrb[0].mxu0  ;;  %v570_v10 = vpop.f32.mrb[0].mxu1 }
  0xe7   : > { %v309_v11 = vadd.f32 %v560_v9, %v520_v8  ;;  %v379_v12 = vadd.f32 %v570_v10, %v520_v8  ;;  %v300_v13 = vpop.f32.mrb[1].mxu0  ;;  %v370_v14 = vpop.f32.mrb[1].mxu1 }
  0xe8   : > { %v301_v15 = vadd.f32 %v520_v8, %v300_v13  ;;  %v371_v16 = vadd.f32 %v520_v8, %v370_v14  ;;  %v561_v17 = vpop.f32.mrb[2].mxu0  ;;  %v571_v18 = vpop.f32.mrb[2].mxu1 }
  0xe9   : > { %403 = vst.msk [vmem:[%s691_s29 + $0x20] sm:$0xff] %vm249_vm1, %v309_v11  ;;  %536 = vst.msk [vmem:[%s691_s29 + $0x28] sm:$0xff] %vm249_vm1, %v379_v12  ;;  %v312_v19 = vadd.f32 %v561_v17, %v520_v8  ;;  %v382_v20 = vadd.f32 %v571_v18, %v520_v8  ;;  %v303_v21 = vpop.f32.mrb[3].mxu0  ;;  %v373_v22 = vpop.f32.mrb[3].mxu1 }
  0xea   : > { %401 = vst.msk [vmem:[%s691_s29] sm:$0xff] %vm249_vm1, %v301_v15  ;;  %534 = vst.msk [vmem:[%s691_s29 + $0x8] sm:$0xff] %vm249_vm1, %v371_v16  ;;  %v304_v23 = vadd.f32 %v520_v8, %v303_v21  ;;  %v374_v24 = vadd.f32 %v520_v8, %v373_v22 }
  0xeb   : > { %404 = vst.msk [vmem:[%s691_s29 + $0x30] sm:$0xff] %vm249_vm1, %v312_v19  ;;  %537 = vst.msk [vmem:[%s691_s29 + $0x38] sm:$0xff] %vm249_vm1, %v382_v20 }
  0xec   : > { %402 = vst.msk [vmem:[%s691_s29 + $0x10] sm:$0xff] %vm249_vm1, %v304_v23  ;;  %535 = vst.msk [vmem:[%s691_s29 + $0x18] sm:$0xff] %vm249_vm1, %v374_v24 }
  0xee   : > { %v564_v25 = vpop.f32.mrb[4].mxu0  ;;  %v574_v26 = vpop.f32.mrb[4].mxu1 }
  0xef   : > { %v325_v27 = vadd.f32 %v564_v25, %v520_v8  ;;  %v395_v28 = vadd.f32 %v574_v26, %v520_v8  ;;  %v316_v29 = vpop.f32.mrb[5].mxu0  ;;  %v386_v30 = vpop.f32.mrb[5].mxu1 }
  0xf0   : > { %v317_v31 = vadd.f32 %v520_v8, %v316_v29  ;;  %v387_v32 = vadd.f32 %v520_v8, %v386_v30  ;;  %v565_v33 = vpop.f32.mrb[6].mxu0  ;;  %v575_v34 = vpop.f32.mrb[6].mxu1 }
  0xf1   : > { %407 = vst.msk [vmem:[%s691_s29 + $0x60] sm:$0xff] %vm249_vm1, %v325_v27  ;;  %540 = vst.msk [vmem:[%s691_s29 + $0x68] sm:$0xff] %vm249_vm1, %v395_v28  ;;  %v328_v35 = vadd.f32 %v565_v33, %v520_v8  ;;  %v398_v36 = vadd.f32 %v575_v34, %v520_v8  ;;  %v319_v37 = vpop.f32.mrb[7].mxu0  ;;  %v389_v38 = vpop.f32.mrb[7].mxu1 }
  0xf2   : > { %405 = vst.msk [vmem:[%s691_s29 + $0x40] sm:$0xff] %vm249_vm1, %v317_v31  ;;  %538 = vst.msk [vmem:[%s691_s29 + $0x48] sm:$0xff] %vm249_vm1, %v387_v32  ;;  %v320_v39 = vadd.f32 %v520_v8, %v319_v37  ;;  %v390_v40 = vadd.f32 %v520_v8, %v389_v38 }
  0xf3   : > { %408 = vst.msk [vmem:[%s691_s29 + $0x70] sm:$0xff] %vm249_vm1, %v328_v35  ;;  %541 = vst.msk [vmem:[%s691_s29 + $0x78] sm:$0xff] %vm249_vm1, %v398_v36 }
  0xf4   : > { %406 = vst.msk [vmem:[%s691_s29 + $0x50] sm:$0xff] %vm249_vm1, %v320_v39  ;;  %539 = vst.msk [vmem:[%s691_s29 + $0x58] sm:$0xff] %vm249_vm1, %v390_v40 }
  0xf5 PF: > { %s13_s14 = sadd.s32 1, %s628_s14   ;;  %s738_s12 = smov %s624_s13 }
  0xf6   : > { %p10_p5 = scmp.ge.s32.totalorder %s13_s14, 4   ;;  %s739_s13 = smov %s741_s15 }
  0xf8   :  { %12 = sbr.rel (!%p10_p5) target bundleno = 2 (0x2), region = 64 }

</bundles_post_ra>
